<compile_context>
chip_gen: v7x
topology: tpu7x:2x2x1
jax: 0.10.0
libtpu: 0.0.40
codegen_flags: <defaults>
</compile_context>

<pallas_src>
import functools

import jax
import jax.numpy as jnp
from jax.experimental import pallas as pl
from jax.experimental.pallas import tpu as pltpu

_LANE = 128


def _round_up(n, m):
    return ((n + m - 1) // m) * m


def _mlp_kernel(x_ref, w1_ref, w2_ref, w3_ref, b_ref, o_ref, *, h1p, h2p, out):
    # In-kernel bf16 cast of the activations (f32 arrives from HBM).
    x = x_ref[...].astype(jnp.bfloat16)

    # Layer 1: (TB, IN)bf16 @ (IN, H1P)bf16 -> f32 acc, bias + ReLU (lane-dense).
    a1 = jnp.dot(x, w1_ref[...], preferred_element_type=jnp.float32)
    a1 = jnp.maximum(a1 + b_ref[:, 0:h1p], 0.0)

    # Layer 2: (TB, H1P) @ (H1P, H2P)
    a2 = jnp.dot(a1.astype(jnp.bfloat16), w2_ref[...],
                 preferred_element_type=jnp.float32)
    a2 = jnp.maximum(a2 + b_ref[:, h1p:h1p + h2p], 0.0)

    # Layer 3: (TB, H2P) @ (H2P, OUT) -> sigmoid, stored at real width.
    a3 = jnp.dot(a2.astype(jnp.bfloat16), w3_ref[...],
                 preferred_element_type=jnp.float32)
    a3 = a3 + b_ref[:, h1p + h2p:h1p + h2p + out]
    o_ref[...] = jax.nn.sigmoid(a3).astype(o_ref.dtype)


def prepare_params(params):
    """One-time conversion of PyTorch-convention params (w: (out,in), b: (out,))
    into the kernel-ready layout: bf16 pre-transposed weights zero-padded so the
    hidden dims are multiples of 128, plus one coalesced f32 bias row with
    128-aligned segments."""
    w1, b1 = params["w1"], params["b1"]
    w2, b2 = params["w2"], params["b2"]
    w3, b3 = params["w3"], params["b3"]

    h1, in_size = w1.shape
    h2 = w2.shape[0]
    out = w3.shape[0]
    h1p = _round_up(h1, _LANE)
    h2p = _round_up(h2, _LANE)
    outp = _round_up(out, _LANE)

    w1t = jnp.zeros((in_size, h1p), jnp.float32).at[:, :h1].set(w1.T)
    w2t = jnp.zeros((h1p, h2p), jnp.float32).at[:h1, :h2].set(w2.T)
    w3t = jnp.zeros((h2p, out), jnp.float32).at[:h2, :].set(w3.T)

    bias = jnp.zeros((1, h1p + h2p + outp), jnp.float32)
    bias = bias.at[0, 0:h1].set(b1)
    bias = bias.at[0, h1p:h1p + h2].set(b2)
    bias = bias.at[0, h1p + h2p:h1p + h2p + out].set(b3)

    return {
        "w1t": w1t.astype(jnp.bfloat16),
        "w2t": w2t.astype(jnp.bfloat16),
        "w3t": w3t.astype(jnp.bfloat16),
        "bias": bias,
        "dims": (in_size, h1, h2, out, h1p, h2p, outp),
    }


def deep_neural_network_forward(x, prep):
    """x: (B, input_size) float32; prep: output of prepare_params."""
    in_size_p, h1, h2, out, h1p, h2p, outp = prep["dims"]
    B, in_size = x.shape
    assert in_size == in_size_p

    # Big batch tile amortizes the ~0.35us/step overhead; pl.cdiv grid + Pallas
    # masking handle the ragged last tile (no wrapper jnp.pad / slice passes).
    TB = min(512, _round_up(B, 8))
    n_steps = pl.cdiv(B, TB)
    bias_w = h1p + h2p + outp

    kernel = functools.partial(_mlp_kernel, h1p=h1p, h2p=h2p, out=out)

    weight_bytes = (prep["w1t"].size + prep["w2t"].size + prep["w3t"].size) * 2
    cost = pl.CostEstimate(
        flops=2 * B * (in_size * h1 + h1 * h2 + h2 * out),
        transcendentals=B * out,
        bytes_accessed=B * in_size * 4 + B * out * 4 + weight_bytes + bias_w * 4,
    )

    return pl.pallas_call(
        kernel,
        out_shape=jax.ShapeDtypeStruct((B, out), jnp.float32),
        grid_spec=pltpu.PrefetchScalarGridSpec(
            num_scalar_prefetch=0,
            grid=(n_steps,),
            in_specs=[
                pl.BlockSpec((TB, in_size), lambda b: (b, 0)),      # x: tiled over batch
                pl.BlockSpec((in_size, h1p), lambda b: (0, 0)),     # weights: VMEM-resident
                pl.BlockSpec((h1p, h2p), lambda b: (0, 0)),
                pl.BlockSpec((h2p, out), lambda b: (0, 0)),
                pl.BlockSpec((1, bias_w), lambda b: (0, 0)),        # coalesced bias
            ],
            out_specs=pl.BlockSpec((TB, out), lambda b: (b, 0)),    # real-width output
        ),
        compiler_params=pltpu.CompilerParams(
            dimension_semantics=("parallel",),                      # dual-TC on v7x
        ),
        cost_estimate=cost,
    )(x, prep["w1t"], prep["w2t"], prep["w3t"], prep["bias"])


def init_params(key, input_size, hidden_size1, hidden_size2, output_size):
    """Deterministic init mimicking nn.Linear's uniform(-1/sqrt(fan_in), 1/sqrt(fan_in))."""
    ks = jax.random.split(key, 6)

    def linear_init(kw, kb, fan_in, fan_out):
        bound = 1.0 / jnp.sqrt(fan_in)
        w = jax.random.uniform(kw, (fan_out, fan_in), jnp.float32, -bound, bound)
        b = jax.random.uniform(kb, (fan_out,), jnp.float32, -bound, bound)
        return w, b

    w1, b1 = linear_init(ks[0], ks[1], input_size, hidden_size1)
    w2, b2 = linear_init(ks[2], ks[3], hidden_size1, hidden_size2)
    w3, b3 = linear_init(ks[4], ks[5], hidden_size2, output_size)
    return {"w1": w1, "b1": b1, "w2": w2, "b2": b2, "w3": w3, "b3": b3}


def reference_forward(x, params):
    """Pure-JAX f32 reference (mirrors the PyTorch forward)."""
    h1 = jnp.maximum(x @ params["w1"].T + params["b1"], 0.0)
    h2 = jnp.maximum(h1 @ params["w2"].T + params["b2"], 0.0)
    return jax.nn.sigmoid(h2 @ params["w3"].T + params["b3"])


if __name__ == "__main__":
    key = jax.random.PRNGKey(0)
    k_param, k_x = jax.random.split(key)

    batch = 8
    input_size, hidden_size1, hidden_size2, output_size = 32, 64, 32, 16

    params = init_params(k_param, input_size, hidden_size1, hidden_size2, output_size)
    prep = prepare_params(params)                    # one-time: transpose/pad/bf16
    x = jax.random.normal(k_x, (batch, input_size), dtype=jnp.float32)

    out = jax.block_until_ready(deep_neural_network_forward(x, prep))
    ref = reference_forward(x, params)
    assert out.shape == (batch, output_size)
    # bf16 MXU operands (f32 accumulation/activations) -> loosened tolerance vs f32 ref.
    assert jnp.allclose(out, ref, atol=2e-2, rtol=2e-2), "mismatch vs reference (B=8)"

    # Ragged single-tile batch (masked last-tile stores).
    x2 = jax.random.normal(jax.random.PRNGKey(1), (77, input_size), dtype=jnp.float32)
    out2 = jax.block_until_ready(deep_neural_network_forward(x2, prep))
    assert out2.shape == (77, output_size)
    assert jnp.allclose(out2, reference_forward(x2, params), atol=2e-2, rtol=2e-2), \
        "mismatch vs reference (B=77 ragged)"

    # Multi-tile batch with ragged final tile (TB=512, grid=3).
    x3 = jax.random.normal(jax.random.PRNGKey(2), (1100, input_size), dtype=jnp.float32)
    out3 = jax.block_until_ready(deep_neural_network_forward(x3, prep))
    assert out3.shape == (1100, output_size)
    assert jnp.allclose(out3, reference_forward(x3, params), atol=2e-2, rtol=2e-2), \
        "mismatch vs reference (B=1100 multi-tile)"

    print("KERNEL_OK")
</pallas_src>

<mosaic_0001>
module attributes {stable_mosaic.version = 11 : i64} {
  func.func @_mlp_kernel(%arg0: i32, %arg1: memref<8x32xf32, #tpu.memory_space<vmem>>, %arg2: memref<32x128xbf16, #tpu.memory_space<vmem>>, %arg3: memref<128x128xbf16, #tpu.memory_space<vmem>>, %arg4: memref<128x16xbf16, #tpu.memory_space<vmem>>, %arg5: memref<1x384xf32, #tpu.memory_space<vmem>>, %arg6: memref<8x16xf32, #tpu.memory_space<vmem>>) attributes {dimension_semantics = [#tpu.dimension_semantics<parallel>], iteration_bounds = array<i64: 1>, scalar_prefetch = 0 : i64, scratch_operands = 0 : i64, tpu.core_type = #tpu.core_type<tc>, window_params = [{transform_indices = @transform_0, window_bounds = array<i64: 8, 32>}, {pipeline_mode = #tpu.pipeline_mode<synchronous>, transform_indices = @transform_1, window_bounds = array<i64: 32, 128>}, {pipeline_mode = #tpu.pipeline_mode<synchronous>, transform_indices = @transform_2, window_bounds = array<i64: 128, 128>}, {pipeline_mode = #tpu.pipeline_mode<synchronous>, transform_indices = @transform_3, window_bounds = array<i64: 128, 16>}, {pipeline_mode = #tpu.pipeline_mode<synchronous>, transform_indices = @transform_4, window_bounds = array<i64: 1, 384>}, {transform_indices = @transform_5, window_bounds = array<i64: 8, 16>}]} {
    %c0 = arith.constant 0 : index
    %c0_0 = arith.constant 0 : index
    %0 = vector.load %arg1[%c0, %c0_0] : memref<8x32xf32, #tpu.memory_space<vmem>>, vector<8x32xf32>
    %1 = arith.truncf %0 : vector<8x32xf32> to vector<8x32xbf16>
    %c0_1 = arith.constant 0 : index
    %c0_2 = arith.constant 0 : index
    %2 = vector.load %arg2[%c0_1, %c0_2] : memref<32x128xbf16, #tpu.memory_space<vmem>>, vector<32x128xbf16>
    %cst = arith.constant dense<0.000000e+00> : vector<8x128xf32>
    %3 = tpu.matmul %1, %2, %cst {dimension_numbers = #tpu.dot_dimension_numbers<[1], [0], [0], [1], [0, 0, 1, 1], [], []>} : vector<8x32xbf16>, vector<32x128xbf16>, vector<8x128xf32> -> vector<8x128xf32>
    %c0_3 = arith.constant 0 : index
    %c0_4 = arith.constant 0 : index
    %4 = vector.load %arg5[%c0_3, %c0_4] : memref<1x384xf32, #tpu.memory_space<vmem>>, vector<1x128xf32>
    %5 = vector.broadcast %4 : vector<1x128xf32> to vector<8x128xf32>
    %6 = arith.addf %3, %5 : vector<8x128xf32>
    %cst_5 = arith.constant 0.000000e+00 : f32
    %7 = vector.broadcast %cst_5 : f32 to vector<8x128xf32>
    %8 = arith.maximumf %6, %7 : vector<8x128xf32>
    %9 = arith.truncf %8 : vector<8x128xf32> to vector<8x128xbf16>
    %c0_6 = arith.constant 0 : index
    %c0_7 = arith.constant 0 : index
    %10 = vector.load %arg3[%c0_6, %c0_7] : memref<128x128xbf16, #tpu.memory_space<vmem>>, vector<128x128xbf16>
    %cst_8 = arith.constant dense<0.000000e+00> : vector<8x128xf32>
    %11 = tpu.matmul %9, %10, %cst_8 {dimension_numbers = #tpu.dot_dimension_numbers<[1], [0], [0], [1], [0, 0, 1, 1], [], []>} : vector<8x128xbf16>, vector<128x128xbf16>, vector<8x128xf32> -> vector<8x128xf32>
    %c0_9 = arith.constant 0 : index
    %c128 = arith.constant 128 : index
    %12 = vector.load %arg5[%c0_9, %c128] : memref<1x384xf32, #tpu.memory_space<vmem>>, vector<1x128xf32>
    %13 = vector.broadcast %12 : vector<1x128xf32> to vector<8x128xf32>
    %14 = arith.addf %11, %13 : vector<8x128xf32>
    %cst_10 = arith.constant 0.000000e+00 : f32
    %15 = vector.broadcast %cst_10 : f32 to vector<8x128xf32>
    %16 = arith.maximumf %14, %15 : vector<8x128xf32>
    %17 = arith.truncf %16 : vector<8x128xf32> to vector<8x128xbf16>
    %c0_11 = arith.constant 0 : index
    %c0_12 = arith.constant 0 : index
    %18 = vector.load %arg4[%c0_11, %c0_12] : memref<128x16xbf16, #tpu.memory_space<vmem>>, vector<128x16xbf16>
    %cst_13 = arith.constant dense<0.000000e+00> : vector<8x16xf32>
    %19 = tpu.matmul %17, %18, %cst_13 {dimension_numbers = #tpu.dot_dimension_numbers<[1], [0], [0], [1], [0, 0, 1, 1], [], []>} : vector<8x128xbf16>, vector<128x16xbf16>, vector<8x16xf32> -> vector<8x16xf32>
    %c0_14 = arith.constant 0 : index
    %c256 = arith.constant 256 : index
    %20 = vector.load %arg5[%c0_14, %c256] : memref<1x384xf32, #tpu.memory_space<vmem>>, vector<1x16xf32>
    %21 = vector.broadcast %20 : vector<1x16xf32> to vector<8x16xf32>
    %22 = arith.addf %19, %21 : vector<8x16xf32>
    %23 = arith.negf %22 : vector<8x16xf32>
    %24 = math.exp %23 : vector<8x16xf32>
    %cst_15 = arith.constant 1.000000e+00 : f32
    %25 = vector.broadcast %cst_15 : f32 to vector<8x16xf32>
    %26 = arith.addf %25, %24 : vector<8x16xf32>
    %27 = arith.divf %25, %26 : vector<8x16xf32>
    %c0_16 = arith.constant 0 : index
    %c0_17 = arith.constant 0 : index
    %28 = vector.load %arg6[%c0_16, %c0_17] : memref<8x16xf32, #tpu.memory_space<vmem>>, vector<8x16xf32>
    tpu.vector_store %arg6[%c0_16, %c0_17], %27 {strides = array<i32>} : memref<8x16xf32, #tpu.memory_space<vmem>>, vector<8x16xf32>,
    return
  }
  func.func @transform_0(%arg0: i32) -> (i32, i32) {
    %c0_i32 = arith.constant 0 : i32
    %c0_i32_0 = arith.constant 0 : i32
    return %arg0, %c0_i32 : i32, i32
  }
  func.func @transform_1(%arg0: i32) -> (i32, i32) {
    %c0_i32 = arith.constant 0 : i32
    %c0_i32_0 = arith.constant 0 : i32
    %c0_i32_1 = arith.constant 0 : i32
    return %c0_i32, %c0_i32_0 : i32, i32
  }
  func.func @transform_2(%arg0: i32) -> (i32, i32) {
    %c0_i32 = arith.constant 0 : i32
    %c0_i32_0 = arith.constant 0 : i32
    %c0_i32_1 = arith.constant 0 : i32
    return %c0_i32, %c0_i32_0 : i32, i32
  }
  func.func @transform_3(%arg0: i32) -> (i32, i32) {
    %c0_i32 = arith.constant 0 : i32
    %c0_i32_0 = arith.constant 0 : i32
    %c0_i32_1 = arith.constant 0 : i32
    return %c0_i32, %c0_i32_0 : i32, i32
  }
  func.func @transform_4(%arg0: i32) -> (i32, i32) {
    %c0_i32 = arith.constant 0 : i32
    %c0_i32_0 = arith.constant 0 : i32
    %c0_i32_1 = arith.constant 0 : i32
    return %c0_i32, %c0_i32_0 : i32, i32
  }
  func.func @transform_5(%arg0: i32) -> (i32, i32) {
    %c0_i32 = arith.constant 0 : i32
    %c0_i32_0 = arith.constant 0 : i32
    return %arg0, %c0_i32 : i32, i32
  }
}

</mosaic_0001>

<bundles_post_ra>
// kernel: tpu_custom_call.1
= control target key start
LH: loop header
LB: loop body
LE: loop exit
PB: predicated region body
PF: predicated region fallthrough
CT: control target
= control target key end

     0   :  { %10 = vsyncpa [#allocation3], 0  ;;  %s666_s0 = inlined_call_operand.vmem [shape: f32[8,32], index: 0, kind: input, shape index: {}]   ;;  %s667_s1 = inlined_call_operand.hbm [shape: bf16[32,128], index: 1, kind: input, shape index: {}]   ;;  %s668_s2 = inlined_call_operand.vmem [shape: bf16[128,128], index: 2, kind: input, shape index: {}]   ;;  %s669_s3 = inlined_call_operand.vmem [shape: bf16[128,16], index: 3, kind: input, shape index: {}]   ;;  %s670_s4 = inlined_call_operand.vmem [shape: f32[1,384], index: 4, kind: input, shape index: {}]   ;;  %s671_s5 = inlined_call_operand.hbm [shape: f32[8,16], index: 5, kind: output, shape index: {}]  }
   0x1   :  { %11 = vsyncpa [#allocation4], 0  ;;  %s522_s18 = smov [#allocation2]   ;;  %s474_s22 = scalar_lea.hbm %s667_s1, 256 }
   0x2   :  { %s19_s19 = sshll.u32 %s522_s18, 4  ;;  %p475_p0 = scmp.ne.s32.totalorder %s667_s1, %s474_s22  ;;  %s20_s19 = int_to_ptr.vmem [resolvable:$true] %s19_s19 }
   0x3   :  { %p478_p1 = scmp.lt.u32.totalorder %s474_s22, %s667_s1 }
   0x5   :  { %p480_p2 = pnand %p478_p1, %p475_p0 }
   0x7   :  { %483 = shalt.err (!%p480_p2)
}
   0x8   :  { %s484_s27 = scalar_lea.vmem %s20_s19, 256  ;;  %p489_p4 = scmp.lt.s32.totalorder %s20_s19, %s20_s19 }
   0x9   :  { %p485_p3 = scmp.ne.s32.totalorder %s20_s19, %s484_s27  ;;  %p490_p5 = scmp.lt.s32.totalorder %s484_s27, %s484_s27 }
   0xb   :  { %p491_p6 = por %p490_p5, %p489_p4 }
   0xd   :  { %p492_p7 = pnand %p491_p6, %p485_p3 }
   0xf   :  { %495 = shalt.err (!%p492_p7)
}
  0x10   :  { %s523_s28 = smov 64   ;;  %s524_s29 = smov 4  }
  0x11   :  { %25 = dma.hbm_to_vmem [thread:$0]  %s667_s1, 256, %s20_s19, [#allocation3], %s523_s28, %s523_s28, %s524_s29  }
  0x12   :  { %518 = dma.done.wait [#allocation3], 256  }
  0x13   :  { %519 = vsyncadd [#allocation3], 4294967040  ;;  %v525_v0 = vmov 0.0   ;;  %vm526_vm0 = vmmov 0   ;;  %v452_v1 = vld [vmem:[#allocation2] sm:$0xff]   ;;  %v453_v2 = vld [vmem:[#allocation2 + $0x8] sm:$0xff]  }
  0x14   :  { %398 = vmatprep.subr.bf16.mxu0 %v525_v0  ;;  %402 = vmatprep.mubr.msk.bf16.mxu0 %vm526_vm0, %v525_v0  ;;  %v36_v3 = vld [vmem:[%s666_s0] sm:$0xff]  ;;  %v455_v6 = vld [vmem:[%s668_s2 + $0x8] sm:$0xff]   ;;  %vm61_vm1 = vcmask 261120   ;;  %v456_v7 = vld [vmem:[%s668_s2 + $0x10] sm:$0xff]   ;;  %vm337_vm2 = vcmask 130048  }
  0x15   :  { %406 = vmatprep.subr.bf16.mxu1 %v525_v0  ;;  %422 = vmatprep.mubr.msk.bf16.mxu1 %vm526_vm0, %v525_v0  ;;  %v454_v4 = vld [vmem:[%s668_s2] sm:$0xff]   ;;  %v37_v5 = vpack.c.bf16 %v36_v3, %v36_v3  ;;  %v457_v8 = vld [vmem:[%s668_s2 + $0x18] sm:$0xff]   ;;  %v459_v10 = vld [vmem:[%s668_s2 + $0x28] sm:$0xff]  }
  0x16   :  { %399 = vmatpush3.bf16.msra.mxu0 %v452_v1  ;;  %407 = vmatpush3.bf16.msra.mxu1 %v454_v4  ;;  %v458_v9 = vld [vmem:[%s668_s2 + $0x20] sm:$0xff]   ;;  %v460_v11 = vld [vmem:[%s668_s2 + $0x30] sm:$0xff]   ;;  %v461_v12 = vld [vmem:[%s668_s2 + $0x38] sm:$0xff]  }
  0x17   :  { %400 = vmatprep.subr.bf16.mxu0 %v525_v0  ;;  %408 = vmatprep.subr.bf16.mxu1 %v525_v0  ;;  %v462_v13 = vld [vmem:[%s669_s3] sm:$0xff]   ;;  %v463_v14 = vld [vmem:[%s669_s3 + $0x8] sm:$0xff]   ;;  %v464_v15 = vld [vmem:[%s669_s3 + $0x10] sm:$0xff]  }
  0x18   :  { %v465_v16 = vld [vmem:[%s669_s3 + $0x18] sm:$0xff]   ;;  %v466_v17 = vld [vmem:[%s669_s3 + $0x20] sm:$0xff]   ;;  %v467_v18 = vld [vmem:[%s669_s3 + $0x28] sm:$0xff]  }
  0x19   :  { %v354_v19 = vld [vmem:[%s670_s4] ss:$0 sm:$0xff]  ;;  %v468_v27 = vld [vmem:[%s669_s3 + $0x30] sm:$0xff]   ;;  %v469_v28 = vld [vmem:[%s669_s3 + $0x38] sm:$0xff]   ;;  %s527_s3 = smov [#allocation5]  }
  0x1a   :  { %401 = vmatpush3.bf16.msra.mxu0 %v453_v2  ;;  %409 = vmatpush3.bf16.msra.mxu1 %v455_v6  ;;  %v358_v29 = vld [vmem:[%s670_s4 + $0x1] ss:$0 sm:$0xff]  ;;  %v367_v37 = vld [vmem:[%s670_s4 + $0x2] ss:$0 sm:$0xff]  ;;  %s345_s17 = sshll.u32 %s527_s3, 4  ;;  %s346_s17 = int_to_ptr.vmem [resolvable:$true] %s345_s17 }
  0x1b   :  { %426 = vmatprep.subr.bf16.mxu0 %v525_v0  ;;  %410 = vmatprep.subr.bf16.mxu1 %v525_v0  ;;  %s496_s18 = scalar_lea.vmem %s346_s17, 128  ;;  %p501_p9 = scmp.lt.s32.totalorder %s346_s17, %s346_s17 }
  0x1c   :  { %p497_p8 = scmp.ne.s32.totalorder %s346_s17, %s496_s18  ;;  %p502_p10 = scmp.lt.s32.totalorder %s496_s18, %s496_s18 }
  0x1d   :  { %403 = vmatmul.mubr.msk.bf16.vlgmr.msra.gmra.mrb[0].mxu0 %vm61_vm1, %v37_v5 }
  0x1e   :  { %442 = vmatprep.mubr.msk.bf16.mxu0 %vm526_vm0, %v525_v0  ;;  %411 = vmatpush3.bf16.msra.mxu1 %v456_v7  ;;  %p503_p11 = por %p502_p10, %p501_p9 }
  0x1f   :  { %412 = vmatprep.subr.bf16.mxu1 %v525_v0  ;;  %427 = vmatpush3.bf16.msra.mxu0 %v462_v13 }
  0x20   :  { %428 = vmatprep.subr.bf16.mxu0 %v525_v0  ;;  %p504_p12 = pnand %p503_p11, %p497_p8 }
  0x22   :  { %413 = vmatpush3.bf16.msra.mxu1 %v457_v8 }
  0x23   :  { %414 = vmatprep.subr.bf16.mxu1 %v525_v0  ;;  %429 = vmatpush3.bf16.msra.mxu0 %v463_v14 }
  0x24   :  { %430 = vmatprep.subr.bf16.mxu0 %v525_v0 }
  0x26   :  { %415 = vmatpush3.bf16.msra.mxu1 %v458_v9 }
  0x27   :  { %416 = vmatprep.subr.bf16.mxu1 %v525_v0  ;;  %431 = vmatpush3.bf16.msra.mxu0 %v464_v15 }
  0x28   :  { %432 = vmatprep.subr.bf16.mxu0 %v525_v0 }
  0x2a   :  { %417 = vmatpush3.bf16.msra.mxu1 %v459_v10 }
  0x2b   :  { %418 = vmatprep.subr.bf16.mxu1 %v525_v0  ;;  %433 = vmatpush3.bf16.msra.mxu0 %v465_v16 }
  0x2c   :  { %434 = vmatprep.subr.bf16.mxu0 %v525_v0 }
  0x2e   :  { %419 = vmatpush3.bf16.msra.mxu1 %v460_v11 }
  0x2f   :  { %420 = vmatprep.subr.bf16.mxu1 %v525_v0  ;;  %435 = vmatpush3.bf16.msra.mxu0 %v466_v17 }
  0x30   :  { %436 = vmatprep.subr.bf16.mxu0 %v525_v0 }
  0x32   :  { %421 = vmatpush3.bf16.msra.mxu1 %v461_v12 }
  0x33   :  { %437 = vmatpush3.bf16.msra.mxu0 %v467_v18 }
  0x34   :  { %438 = vmatprep.subr.bf16.mxu0 %v525_v0 }
  0x37   :  { %439 = vmatpush3.bf16.msra.mxu0 %v468_v27 }
  0x38   :  { %440 = vmatprep.subr.bf16.mxu0 %v525_v0 }
  0x3b   :  { %441 = vmatpush3.bf16.msra.mxu0 %v469_v28 }
  0xf0   :  { %v99_v20 = vpop.f32.mrb[0].mxu0 }
  0xf1   :  { %v100_v21 = vadd.f32 %v354_v19, %v99_v20  ;;  %v404_v22 = vpop.f32.mrb[1].mxu0 }
  0xf2   :  { %v102_v23 = vpop.f32.mrb[2].mxu0 }
  0xf3   :  { %v105_v24 = vmax.f32 %v100_v21, 0.0  ;;  %v405_v25 = vpop.f32.mrb[3].mxu0 }
  0xf5   :  { %v106_v26 = vpack.c.bf16 %v105_v24, %v105_v24 }
  0xf7   :  { %423 = vmatmul.mubr.bf16.vlgmr.msra.gmra.mrb[0].mxu1 %v106_v26 }
 0x1ca   :  { %v212_v30 = vpop.f32.mrb[0].mxu1 }
 0x1cb   :  { %v213_v31 = vadd.f32 %v358_v29, %v212_v30  ;;  %v424_v32 = vpop.f32.mrb[1].mxu1 }
 0x1cc   :  { %v215_v33 = vpop.f32.mrb[2].mxu1 }
 0x1cd   :  { %v218_v34 = vmax.f32 %v213_v31, 0.0  ;;  %v425_v35 = vpop.f32.mrb[3].mxu1 }
 0x1cf   :  { %v219_v36 = vpack.c.bf16 %v218_v34, %v218_v34 }
 0x1d1   :  { %443 = vmatmul.mubr.bf16.vlgmr.msra.gmra.mrb[4].mxu0 %v219_v36 }
 0x2a4   :  { %v325_v38 = vpop.f32.mrb[4].mxu0 }
 0x2a5   :  { %v326_v39 = vadd.f32 %v367_v37, %v325_v38  ;;  %v444_v40 = vpop.f32.mrb[5].mxu0 }
 0x2a6   :  { %v328_v41 = vpop.f32.mrb[6].mxu0 }
 0x2a7   :  { %v376_v42 = vmul.f32 -1.442695, %v326_v39  ;;  %v445_v43 = vpop.f32.mrb[7].mxu0 }
 0x2a9   :  { %470 = vpow2.f32 %v376_v42 }
 0x2b3   :  { %v471_v44 = vpop.eup %470 }
 0x2b4   :  { %v334_v45 = vadd.f32 1.0, %v471_v44 }
 0x2b6   :  { %472 = vrcp.f32 %v334_v45 }
 0x2c0   :  { %v473_v46 = vpop.eup %472 }
 0x2c1   :  { %338 = vst.msk [vmem:[#allocation5] sm:$0xff] %vm337_vm2, %v473_v46 }
 0x2c2   :  { %507 = shalt.err (!%p504_p12)
}
 0x2c3   :  { %s508_s20 = scalar_lea.hbm %s671_s5, 128 }
 0x2c4   :  { %p509_p13 = scmp.ne.s32.totalorder %s671_s5, %s508_s20  ;;  %p512_p0 = scmp.lt.u32.totalorder %s508_s20, %s671_s5 }
 0x2c6   :  { %p514_p1 = pnand %p512_p0, %p509_p13 }
 0x2c8   :  { %517 = shalt.err (!%p514_p1)
}
 0x2c9   :  { %348 = dma.vmem_to_hbm [thread:$0]  %s346_s17, 128, %s671_s5, [#allocation4]  }
 0x2ca   :  { %520 = dma.done.wait [#allocation4], 128  }
 0x2cb   :  { %521 = vsyncadd [#allocation4], 4294967168 }
 0x2cc   :  { %352 = vsyncpa [#allocation3], 1 }
 0x2cd   :  { %353 = vsyncpa [#allocation4], 1 }

</bundles_post_ra>
